<compile_context>
chip_gen: v5e
topology: v5e:2x2
jax: 0.10.0
libtpu: 0.0.40
codegen_flags: <defaults>
</compile_context>

<pallas_src>
import math
import functools

import jax
import jax.numpy as jnp
from jax import lax
from jax.experimental import pallas as pl
from jax.experimental.pallas import tpu as pltpu


_SQRT2_INV = 1.0 / math.sqrt(2.0)


@functools.lru_cache(maxsize=1)
def _vmem_limit_bytes():
    """~75% of per-core VMEM: ~48 MiB on v7x (64 MiB parts), ~96 MiB on v5e/v6e."""
    cap = None
    try:
        cap = getattr(pltpu.get_tpu_info(), "vmem_capacity_bytes", None)
    except Exception:
        cap = None
    if not cap:
        cap = 64 * 1024 * 1024          # conservative fallback (v7x-sized)
    return int(cap) * 3 // 4


def _pick_tile(dim, target, align):
    """Largest multiple of `align` that divides `dim` and is <= target, else full dim."""
    if dim <= target:
        return dim
    t = (target // align) * align
    while t >= align:
        if dim % t == 0:
            return t
        t -= align
    return dim


def _tile_and_pad(dim, target, align):
    """Pick (tile, padded_dim) with tile | padded_dim and tile <= target."""
    if dim <= target:
        return dim, dim
    base = ((dim + align - 1) // align) * align      # minimal alignment padding
    t = _pick_tile(base, target, align)
    if t >= max(align, target // 4):
        return t, base
    t = max(align, (target // align) * align)        # pad up to a full-size tile
    return t, ((dim + t - 1) // t) * t


def _pad_axis(a, axis, new_size):
    pad = new_size - a.shape[axis]
    if pad == 0:
        return a
    widths = [(0, 0)] * a.ndim
    widths[axis] = (0, pad)
    return jnp.pad(a, widths)


# ----------------------------- fused LayerNorm + Linear -----------------------------

def _ln_linear_kernel(x_ref, lnw_ref, lnb_ref, w_ref, b_ref, o_ref, h_sc,
                      *, eps, activation):
    # LayerNorm matches the hand-rolled torch module: unbiased std (K-1 divisor),
    # eps added to std (not variance):  w * (x - mean) / (std + eps) + b.
    # The normalized + bf16-cast row block is computed once per row block (j == 0)
    # and cached in VMEM scratch for all output-column tiles.
    @pl.when(pl.program_id(1) == 0)
    def _():
        x = x_ref[...].astype(jnp.float32)                       # (tm, K)
        K = x.shape[-1]
        mean = jnp.mean(x, axis=-1, keepdims=True)
        var = jnp.sum((x - mean) ** 2, axis=-1, keepdims=True) * (1.0 / (K - 1))
        inv = pl.reciprocal(jnp.sqrt(var) + eps, approx=True)    # EUP, frees VALU
        h = lnw_ref[...] * (x - mean) * inv + lnb_ref[...]
        h_sc[...] = h.astype(jnp.bfloat16)

    y = jnp.dot(h_sc[...], w_ref[...], preferred_element_type=jnp.float32) + b_ref[...]
    if activation == "gelu":                                     # exact erf-GELU
        y = 0.5 * y * (1.0 + lax.erf(y * _SQRT2_INV))
    o_ref[...] = y.astype(o_ref.dtype)


def ln_linear(x2d, ln_w, ln_b, w, b, activation=None, eps=1e-6,
              tm_target=1024, tn_target=1024, out_dtype=jnp.bfloat16):
    """y = act(LayerNorm(x) @ W + b).  K kept un-tiled (LN needs the full row)."""
    M, K = x2d.shape
    K2, N = w.shape
    assert K == K2
    tm, Mp = _tile_and_pad(M, tm_target, 8)
    tn, Np = _tile_and_pad(N, tn_target, 128)
    x2d = _pad_axis(x2d.astype(jnp.bfloat16), 0, Mp)
    w = _pad_axis(w.astype(jnp.bfloat16), 1, Np)
    b = _pad_axis(b.astype(jnp.float32), 0, Np).reshape(1, Np)
    kernel = functools.partial(_ln_linear_kernel, eps=eps, activation=activation)
    flops = 2 * Mp * Np * K + 8 * Mp * K
    transc = Mp * Np if activation == "gelu" else Mp
    bytes_accessed = 2 * Mp * K + 2 * K * Np + 4 * Np + 2 * Mp * Np + 8 * K
    out = pl.pallas_call(
        kernel,
        out_shape=jax.ShapeDtypeStruct((Mp, Np), out_dtype),
        grid=(Mp // tm, Np // tn),
        in_specs=[
            pl.BlockSpec((tm, K), lambda i, j: (i, 0)),
            pl.BlockSpec((1, K), lambda i, j: (0, 0)),
            pl.BlockSpec((1, K), lambda i, j: (0, 0)),
            pl.BlockSpec((K, tn), lambda i, j: (0, j)),
            pl.BlockSpec((1, tn), lambda i, j: (0, j)),
        ],
        out_specs=pl.BlockSpec((tm, tn), lambda i, j: (i, j)),
        scratch_shapes=[pltpu.VMEM((tm, K), jnp.bfloat16)],
        compiler_params=pltpu.CompilerParams(
            dimension_semantics=("parallel", "arbitrary"),
            vmem_limit_bytes=_vmem_limit_bytes()),
        cost_estimate=pl.CostEstimate(flops=flops, transcendentals=transc,
                                      bytes_accessed=bytes_accessed),
    )(x2d, ln_w.reshape(1, K).astype(jnp.float32),
      ln_b.reshape(1, K).astype(jnp.float32), w, b)
    return out[:M, :N]


# --------------------- tiled Linear (+bias, optional residual) ----------------------

def _matmul_kernel(*refs, has_residual, activation):
    if has_residual:
        x_ref, w_ref, b_ref, res_ref, o_ref, acc_ref = refs
    else:
        x_ref, w_ref, b_ref, o_ref, acc_ref = refs
    k = pl.program_id(2)

    @pl.when(k == 0)
    def _():
        acc_ref[...] = jnp.zeros_like(acc_ref)

    acc_ref[...] += jnp.dot(x_ref[...], w_ref[...],
                            preferred_element_type=jnp.float32)

    @pl.when(k == pl.num_programs(2) - 1)
    def _():
        y = acc_ref[...] + b_ref[...]
        if activation == "gelu":
            y = 0.5 * y * (1.0 + lax.erf(y * _SQRT2_INV))
        if has_residual:
            y = y + res_ref[...].astype(jnp.float32)
        o_ref[...] = y.astype(o_ref.dtype)


def linear(x2d, w, b, residual=None, activation=None,
           tm_target=1024, tn_target=1024, tk_target=1024, out_dtype=jnp.bfloat16):
    """y = [residual +] act(x @ W + b), K-accumulating tiled matmul (bf16 in, f32 acc)."""
    M, K = x2d.shape
    K2, N = w.shape
    assert K == K2
    tm, Mp = _tile_and_pad(M, tm_target, 8)
    tn, Np = _tile_and_pad(N, tn_target, 128)
    tk, Kp = _tile_and_pad(K, tk_target, 128)
    x2d = _pad_axis(_pad_axis(x2d.astype(jnp.bfloat16), 0, Mp), 1, Kp)
    w = _pad_axis(_pad_axis(w.astype(jnp.bfloat16), 0, Kp), 1, Np)
    b = _pad_axis(b.astype(jnp.float32), 0, Np).reshape(1, Np)
    has_residual = residual is not None
    kernel = functools.partial(_matmul_kernel, has_residual=has_residual,
                               activation=activation)

    in_specs = [
        pl.BlockSpec((tm, tk), lambda i, j, k: (i, k)),
        # TODO(synk): on v5e set pipeline_mode=pl.Buffered(3) on this weight stream
        # if the profile shows exposed DMA at these tile sizes.
        pl.BlockSpec((tk, tn), lambda i, j, k: (k, j)),
        pl.BlockSpec((1, tn), lambda i, j, k: (0, j)),
    ]
    args = [x2d, w, b]
    if has_residual:
        residual = _pad_axis(_pad_axis(residual.astype(jnp.bfloat16), 0, Mp), 1, Np)
        in_specs.append(pl.BlockSpec((tm, tn), lambda i, j, k: (i, j)))
        args.append(residual)

    flops = 2 * Mp * Np * Kp
    transc = Mp * Np if activation == "gelu" else 0
    bytes_accessed = (2 * Mp * Kp + 2 * Kp * Np + 4 * Np
                      + 2 * Mp * Np * (2 if has_residual else 1))
    out = pl.pallas_call(
        kernel,
        out_shape=jax.ShapeDtypeStruct((Mp, Np), out_dtype),
        grid=(Mp // tm, Np // tn, Kp // tk),
        in_specs=in_specs,
        out_specs=pl.BlockSpec((tm, tn), lambda i, j, k: (i, j)),
        scratch_shapes=[pltpu.VMEM((tm, tn), jnp.float32)],
        compiler_params=pltpu.CompilerParams(
            dimension_semantics=("parallel", "parallel", "arbitrary"),
            vmem_limit_bytes=_vmem_limit_bytes()),
        cost_estimate=pl.CostEstimate(flops=flops, transcendentals=transc,
                                      bytes_accessed=bytes_accessed),
    )(*args)
    return out[:M, :N]


# ------------------------- flash-style causal attention -----------------------------

def _flash_attn_kernel(q_ref, k_ref, v_ref, o_ref, m_sc, l_sc, acc_sc,
                       *, scale, tq, tkv):
    qi = pl.program_id(2)
    ki = pl.program_id(3)

    @pl.when(ki == 0)
    def _():
        m_sc[...] = jnp.full_like(m_sc, -jnp.inf)
        l_sc[...] = jnp.zeros_like(l_sc)
        acc_sc[...] = jnp.zeros_like(acc_sc)

    # Skip K/V blocks that lie entirely above the causal diagonal.
    @pl.when(ki * tkv < (qi + 1) * tq)
    def _():
        q = q_ref[0, 0]                                          # (tq, D) bf16
        k = k_ref[0, 0]                                          # (tkv, D) bf16
        v = v_ref[0, 0]
        # q @ k^T without materializing the transpose (contract on the D axis).
        s = lax.dot_general(q, k, (((1,), (1,)), ((), ())),
                            preferred_element_type=jnp.float32) * scale
        row = qi * tq + lax.broadcasted_iota(jnp.int32, (tq, tkv), 0)
        col = ki * tkv + lax.broadcasted_iota(jnp.int32, (tq, tkv), 1)
        # Safe: the ki==0 block always has col 0 visible for every row, so m becomes
        # finite on the first processed block (no exp(-inf - -inf) NaN).
        s = jnp.where(col <= row, s, -jnp.inf)
        m_prev = m_sc[...]
        m_new = jnp.maximum(m_prev, jnp.max(s, axis=-1, keepdims=True))
        a = jnp.exp(m_prev - m_new)
        p = jnp.exp(s - m_new)
        l_sc[...] = a * l_sc[...] + jnp.sum(p, axis=-1, keepdims=True)
        acc_sc[...] = a * acc_sc[...] + jnp.dot(p.astype(jnp.bfloat16), v,
                                                preferred_element_type=jnp.float32)
        m_sc[...] = m_new

    @pl.when(ki == pl.num_programs(3) - 1)
    def _():
        o_ref[0, 0] = (acc_sc[...] * pl.reciprocal(l_sc[...], approx=True)
                       ).astype(o_ref.dtype)


def causal_attention(q, k, v, tq_target=256, tkv_target=512):
    """Flash-style causal attention over head-major [B, H, T, D] bf16 tensors."""
    B, H, T, D = q.shape
    tq = _pick_tile(T, tq_target, 8)
    tkv = _pick_tile(T, tkv_target, 8)
    scale = float(D) ** -0.5
    kernel = functools.partial(_flash_attn_kernel, scale=scale, tq=tq, tkv=tkv)
    flops = 4 * B * H * T * T * D
    transc = B * H * T * T
    bytes_accessed = 2 * 4 * B * H * T * D
    # TODO(synk): batch several heads per grid step (batched dot_general) to fill the
    # 256-wide MXU contraction on v6e/v7x when head_dim is small.
    return pl.pallas_call(
        kernel,
        out_shape=jax.ShapeDtypeStruct((B, H, T, D), jnp.bfloat16),
        grid=(B, H, T // tq, T // tkv),
        in_specs=[
            pl.BlockSpec((1, 1, tq, D), lambda b, h, qi, ki: (b, h, qi, 0)),
            pl.BlockSpec((1, 1, tkv, D), lambda b, h, qi, ki: (b, h, ki, 0)),
            pl.BlockSpec((1, 1, tkv, D), lambda b, h, qi, ki: (b, h, ki, 0)),
        ],
        out_specs=pl.BlockSpec((1, 1, tq, D), lambda b, h, qi, ki: (b, h, qi, 0)),
        scratch_shapes=[pltpu.VMEM((tq, 1), jnp.float32),
                        pltpu.VMEM((tq, 1), jnp.float32),
                        pltpu.VMEM((tq, D), jnp.float32)],
        compiler_params=pltpu.CompilerParams(
            dimension_semantics=("parallel", "parallel", "parallel", "arbitrary"),
            vmem_limit_bytes=_vmem_limit_bytes()),
        cost_estimate=pl.CostEstimate(flops=flops, transcendentals=transc,
                                      bytes_accessed=bytes_accessed),
    )(q.astype(jnp.bfloat16), k.astype(jnp.bfloat16), v.astype(jnp.bfloat16))


# ----------------------------- parameters -----------------------------

def init_params(key, cfg):
    keys = iter(jax.random.split(key, 8 + 4 * cfg["n_layer"]))

    def lin(in_dim, out_dim):
        w = 0.02 * jax.random.normal(next(keys), (in_dim, out_dim), jnp.float32)
        return w.astype(jnp.bfloat16), jnp.zeros((out_dim,), jnp.float32)

    C = cfg["n_embed"]
    params = {
        "tok_emb": 0.02 * jax.random.normal(next(keys), (cfg["vocab_size"], C), jnp.float32),
        "pos_emb": 0.02 * jax.random.normal(next(keys), (cfg["block_size"], C), jnp.float32),
        "blocks": [],
        "lnf_w": jnp.ones((C,), jnp.float32),
        "lnf_b": jnp.zeros((C,), jnp.float32),
    }
    for _ in range(cfg["n_layer"]):
        blk = {}
        blk["ln1_w"] = jnp.ones((C,), jnp.float32)
        blk["ln1_b"] = jnp.zeros((C,), jnp.float32)
        blk["qkv_w"], blk["qkv_b"] = lin(C, 3 * C)
        blk["attn_out_w"], blk["attn_out_b"] = lin(C, C)
        blk["ln2_w"] = jnp.ones((C,), jnp.float32)
        blk["ln2_b"] = jnp.zeros((C,), jnp.float32)
        blk["up_w"], blk["up_b"] = lin(C, 4 * C)
        blk["down_w"], blk["down_b"] = lin(4 * C, C)
        params["blocks"].append(blk)
    params["head_w"], params["head_b"] = lin(C, cfg["vocab_size"])
    return params


# ----------------------------- forward pass -----------------------------

def gpt_forward(params, idx, cfg):
    B, T = idx.shape
    C, H = cfg["n_embed"], cfg["n_head"]
    D = C // H
    assert T <= cfg["block_size"]

    # TODO(synk): embedding gather kept as JAX glue (jnp.take); a DMA-gather kernel
    # would need scalar-prefetch of idx and isn't worth it at these sizes.
    temb = jnp.take(params["tok_emb"], idx, axis=0)            # (B, T, C) f32
    pemb = params["pos_emb"][:T][None, :, :]                   # (1, T, C)
    x = (temb + pemb).astype(jnp.bfloat16).reshape(B * T, C)   # dropout p=0.0 -> identity

    for blk in params["blocks"]:
        # --- attention sub-block: x = x + out_proj(attn(LN1(x))) ---
        qkv = ln_linear(x, blk["ln1_w"], blk["ln1_b"], blk["qkv_w"], blk["qkv_b"])
        # Head split/merge is pure layout glue left to XLA, so the attention kernel
        # only sees lane-dense head-major [B, H, T, D] blocks (no in-kernel lane slices).
        qkv = jnp.transpose(qkv.reshape(B, T, 3, H, D), (2, 0, 3, 1, 4))  # (3,B,H,T,D)
        attn = causal_attention(qkv[0], qkv[1], qkv[2])                    # (B,H,T,D)
        attn = jnp.transpose(attn, (0, 2, 1, 3)).reshape(B * T, C)
        x = linear(attn, blk["attn_out_w"], blk["attn_out_b"], residual=x)

        # --- MLP sub-block: x = x + down(gelu(up(LN2(x)))) ---
        h = ln_linear(x, blk["ln2_w"], blk["ln2_b"], blk["up_w"], blk["up_b"],
                      activation="gelu")
        x = linear(h, blk["down_w"], blk["down_b"], residual=x)

    # target is None -> final LayerNorm + vocab head on the last position only
    # (LayerNorm is row-wise, so LN(x)[:, -1] == LN(x[:, -1])).
    x_last = x.reshape(B, T, C)[:, -1, :]                       # (B, C)
    logits = ln_linear(x_last, params["lnf_w"], params["lnf_b"],
                       params["head_w"], params["head_b"],
                       tn_target=2048, out_dtype=jnp.float32)
    return logits.reshape(B, 1, cfg["vocab_size"]), None


# ----------------------------- main -----------------------------

if __name__ == "__main__":
    cfg = dict(
        block_size=8,
        vocab_size=512,
        n_layer=2,
        n_head=4,
        n_embed=32,
        dropout=0.0,
        bias=True,
    )
    B, T = 2, 8

    key = jax.random.PRNGKey(0)
    k_params, k_idx = jax.random.split(key)
    params = init_params(k_params, cfg)
    idx = jax.random.randint(k_idx, (B, T), 0, cfg["vocab_size"], dtype=jnp.int32)

    logits, loss = gpt_forward(params, idx, cfg)
    logits = jax.block_until_ready(logits)
    assert logits.shape == (B, 1, cfg["vocab_size"])
    assert loss is None
    assert bool(jnp.all(jnp.isfinite(logits)))
    print("KERNEL_OK")
</pallas_src>

<mosaic_0001>
module attributes {stable_mosaic.version = 11 : i64} {
  func.func @_ln_linear_kernel(%arg0: i32, %arg1: i32, %arg2: memref<16x32xbf16, #tpu.memory_space<vmem>>, %arg3: memref<1x32xf32, #tpu.memory_space<vmem>>, %arg4: memref<1x32xf32, #tpu.memory_space<vmem>>, %arg5: memref<32x96xbf16, #tpu.memory_space<vmem>>, %arg6: memref<1x96xf32, #tpu.memory_space<vmem>>, %arg7: memref<16x96xbf16, #tpu.memory_space<vmem>>, %arg8: memref<16x32xbf16, #tpu.memory_space<vmem>>) attributes {dimension_semantics = [#tpu.dimension_semantics<parallel>, #tpu.dimension_semantics<arbitrary>], iteration_bounds = array<i64: 1, 1>, scalar_prefetch = 0 : i64, scratch_operands = 1 : i64, tpu.core_type = #tpu.core_type<tc>, window_params = [{transform_indices = @transform_0, window_bounds = array<i64: 16, 32>}, {pipeline_mode = #tpu.pipeline_mode<synchronous>, transform_indices = @transform_1, window_bounds = array<i64: 1, 32>}, {pipeline_mode = #tpu.pipeline_mode<synchronous>, transform_indices = @transform_2, window_bounds = array<i64: 1, 32>}, {transform_indices = @transform_3, window_bounds = array<i64: 32, 96>}, {transform_indices = @transform_4, window_bounds = array<i64: 1, 96>}, {transform_indices = @transform_5, window_bounds = array<i64: 16, 96>}]} {
    %c0_i32 = arith.constant 0 : i32
    %0 = arith.cmpi eq, %arg1, %c0_i32 : i32
    %1 = arith.extui %0 : i1 to i32
    %c0_i32_0 = arith.constant 0 : i32
    %2 = arith.cmpi ne, %1, %c0_i32_0 : i32
    scf.if %2 {
      %c0_8 = arith.constant 0 : index
      %c0_9 = arith.constant 0 : index
      %11 = vector.load %arg2[%c0_8, %c0_9] : memref<16x32xbf16, #tpu.memory_space<vmem>>, vector<16x32xbf16>
      %12 = arith.extf %11 : vector<16x32xbf16> to vector<16x32xf32>
      %cst_10 = arith.constant dense<0.000000e+00> : vector<16xf32>
      %13 = vector.multi_reduction <add>, %12, %cst_10 [1] : vector<16x32xf32> to vector<16xf32>
      %14 = vector.shape_cast %13 : vector<16xf32> to vector<16x1xf32>
      %cst_11 = arith.constant 3.200000e+01 : f32
      %15 = vector.broadcast %cst_11 : f32 to vector<16x1xf32>
      %16 = arith.divf %14, %15 : vector<16x1xf32>
      %17 = vector.broadcast %16 : vector<16x1xf32> to vector<16x32xf32>
      %18 = arith.subf %12, %17 : vector<16x32xf32>
      %19 = arith.mulf %18, %18 : vector<16x32xf32>
      %cst_12 = arith.constant dense<0.000000e+00> : vector<16xf32>
      %20 = vector.multi_reduction <add>, %19, %cst_12 [1] : vector<16x32xf32> to vector<16xf32>
      %21 = vector.shape_cast %20 : vector<16xf32> to vector<16x1xf32>
      %cst_13 = arith.constant 0.0322580636 : f32
      %22 = vector.broadcast %cst_13 : f32 to vector<16x1xf32>
      %23 = arith.mulf %21, %22 : vector<16x1xf32>
      %24 = math.sqrt %23 : vector<16x1xf32>
      %cst_14 = arith.constant 9.99999997E-7 : f32
      %25 = vector.broadcast %cst_14 : f32 to vector<16x1xf32>
      %26 = arith.addf %24, %25 : vector<16x1xf32>
      %27 = tpu.reciprocal %26 {approx = true} : vector<16x1xf32> -> vector<16x1xf32>
      %c0_15 = arith.constant 0 : index
      %c0_16 = arith.constant 0 : index
      %28 = vector.load %arg3[%c0_15, %c0_16] : memref<1x32xf32, #tpu.memory_space<vmem>>, vector<1x32xf32>
      %29 = vector.broadcast %16 : vector<16x1xf32> to vector<16x32xf32>
      %30 = arith.subf %12, %29 : vector<16x32xf32>
      %31 = vector.broadcast %28 : vector<1x32xf32> to vector<16x32xf32>
      %32 = arith.mulf %31, %30 : vector<16x32xf32>
      %33 = vector.broadcast %27 : vector<16x1xf32> to vector<16x32xf32>
      %34 = arith.mulf %32, %33 : vector<16x32xf32>
      %c0_17 = arith.constant 0 : index
      %c0_18 = arith.constant 0 : index
      %35 = vector.load %arg4[%c0_17, %c0_18] : memref<1x32xf32, #tpu.memory_space<vmem>>, vector<1x32xf32>
      %36 = vector.broadcast %35 : vector<1x32xf32> to vector<16x32xf32>
      %37 = arith.addf %34, %36 : vector<16x32xf32>
      %38 = arith.truncf %37 : vector<16x32xf32> to vector<16x32xbf16>
      %c0_19 = arith.constant 0 : index
      %c0_20 = arith.constant 0 : index
      %39 = vector.load %arg8[%c0_19, %c0_20] : memref<16x32xbf16, #tpu.memory_space<vmem>>, vector<16x32xbf16>
      tpu.vector_store %arg8[%c0_19, %c0_20], %38 {strides = array<i32>} : memref<16x32xbf16, #tpu.memory_space<vmem>>, vector<16x32xbf16>,
    } else {
    }
    %c0 = arith.constant 0 : index
    %c0_1 = arith.constant 0 : index
    %3 = vector.load %arg8[%c0, %c0_1] : memref<16x32xbf16, #tpu.memory_space<vmem>>, vector<16x32xbf16>
    %c0_2 = arith.constant 0 : index
    %c0_3 = arith.constant 0 : index
    %4 = vector.load %arg5[%c0_2, %c0_3] : memref<32x96xbf16, #tpu.memory_space<vmem>>, vector<32x96xbf16>
    %cst = arith.constant dense<0.000000e+00> : vector<16x96xf32>
    %5 = tpu.matmul %3, %4, %cst {dimension_numbers = #tpu.dot_dimension_numbers<[1], [0], [0], [1], [0, 0, 1, 1], [], []>} : vector<16x32xbf16>, vector<32x96xbf16>, vector<16x96xf32> -> vector<16x96xf32>
    %c0_4 = arith.constant 0 : index
    %c0_5 = arith.constant 0 : index
    %6 = vector.load %arg6[%c0_4, %c0_5] : memref<1x96xf32, #tpu.memory_space<vmem>>, vector<1x96xf32>
    %7 = vector.broadcast %6 : vector<1x96xf32> to vector<16x96xf32>
    %8 = arith.addf %5, %7 : vector<16x96xf32>
    %9 = arith.truncf %8 : vector<16x96xf32> to vector<16x96xbf16>
    %c0_6 = arith.constant 0 : index
    %c0_7 = arith.constant 0 : index
    %10 = vector.load %arg7[%c0_6, %c0_7] : memref<16x96xbf16, #tpu.memory_space<vmem>>, vector<16x96xbf16>
    tpu.vector_store %arg7[%c0_6, %c0_7], %9 {strides = array<i32>} : memref<16x96xbf16, #tpu.memory_space<vmem>>, vector<16x96xbf16>,
    return
  }
  func.func @transform_0(%arg0: i32, %arg1: i32) -> (i32, i32) {
    %c0_i32 = arith.constant 0 : i32
    %c0_i32_0 = arith.constant 0 : i32
    return %arg0, %c0_i32 : i32, i32
  }
  func.func @transform_1(%arg0: i32, %arg1: i32) -> (i32, i32) {
    %c0_i32 = arith.constant 0 : i32
    %c0_i32_0 = arith.constant 0 : i32
    %c0_i32_1 = arith.constant 0 : i32
    return %c0_i32, %c0_i32_0 : i32, i32
  }
  func.func @transform_2(%arg0: i32, %arg1: i32) -> (i32, i32) {
    %c0_i32 = arith.constant 0 : i32
    %c0_i32_0 = arith.constant 0 : i32
    %c0_i32_1 = arith.constant 0 : i32
    return %c0_i32, %c0_i32_0 : i32, i32
  }
  func.func @transform_3(%arg0: i32, %arg1: i32) -> (i32, i32) {
    %c0_i32 = arith.constant 0 : i32
    %c0_i32_0 = arith.constant 0 : i32
    return %c0_i32, %arg1 : i32, i32
  }
  func.func @transform_4(%arg0: i32, %arg1: i32) -> (i32, i32) {
    %c0_i32 = arith.constant 0 : i32
    %c0_i32_0 = arith.constant 0 : i32
    return %c0_i32, %arg1 : i32, i32
  }
  func.func @transform_5(%arg0: i32, %arg1: i32) -> (i32, i32) {
    %c0_i32 = arith.constant 0 : i32
    return %arg0, %arg1 : i32, i32
  }
}

</mosaic_0001>

<bundles_post_ra>
// kernel: tpu_custom_call.1
= control target key start
LH: loop header
LB: loop body
LE: loop exit
PB: predicated region body
PF: predicated region fallthrough
CT: control target
= control target key end

     0   :  { %10 = vsyncpa [#allocation4], 0  ;;  %s431_s0 = inlined_call_operand.hbm [shape: bf16[16,32], index: 0, kind: input, shape index: {}]   ;;  %s432_s1 = inlined_call_operand.hbm [shape: f32[1,32], index: 1, kind: input, shape index: {}]   ;;  %s433_s2 = inlined_call_operand.vmem [shape: f32[1,32], index: 2, kind: input, shape index: {}]   ;;  %s434_s3 = inlined_call_operand.hbm [shape: bf16[32,96], index: 3, kind: input, shape index: {}]   ;;  %s435_s4 = inlined_call_operand.vmem [shape: f32[1,96], index: 4, kind: input, shape index: {}]   ;;  %s436_s5 = inlined_call_operand.hbm [shape: bf16[16,96], index: 5, kind: output, shape index: {}]  }
   0x1   :  { %11 = vsyncpa [#allocation7], 0  ;;  %s31_s20 = sshll.u32 %s432_s1, 4  ;;  %s32_s20 = int_to_ptr.hbm [resolvable:$true] %s31_s20 }
   0x2   :  { %12 = vsyncpa [#allocation5], 0  ;;  %s362_s21 = smov [#allocation6]   ;;  %s17_s25 = sshll.u32 %s431_s0, 4  ;;  %s18_s25 = int_to_ptr.hbm [resolvable:$true] %s17_s25 }
   0x3   :  { %s33_s22 = sshll.u32 %s362_s21, 4  ;;  %s363_s26 = smov [#allocation3]   ;;  %s34_s22 = int_to_ptr.vmem [resolvable:$true] %s33_s22 }
   0x4   :  { %36 = dma.hbm_to_vmem [thread:$0]  %s32_s20, 16, %s34_s22, [#allocation7]  }
   0x5   :  { %s19_s27 = sshll.u32 %s363_s26, 4  ;;  %s364_s28 = smov 64   ;;  %s20_s27 = int_to_ptr.vmem [resolvable:$true] %s19_s27 }
   0x6   :  { %s365_s29 = smov 4   ;;  %s43_s6 = sshll.u32 %s434_s3, 4  ;;  %s44_s6 = int_to_ptr.hbm [resolvable:$true] %s43_s6 }
   0x7   :  { %25 = dma.hbm_to_vmem [thread:$0]  %s18_s25, 128, %s20_s27, [#allocation4], %s364_s28, %s364_s28, %s365_s29  }
   0x8   :  { %s366_s7 = smov [#allocation8]  }
   0x9   :  { %s45_s8 = sshll.u32 %s366_s7, 4  ;;  %s46_s8 = int_to_ptr.vmem [resolvable:$true] %s45_s8 }
   0xa   :  { %51 = dma.hbm_to_vmem [thread:$0]  %s44_s6, 256, %s46_s8, [#allocation7], %s364_s28, %s364_s28, %s365_s29  }
   0xb   :  { %356 = dma.done.wait [#allocation4], 128  }
   0xc   :  { %357 = vsyncadd [#allocation4], 4294967168 }
   0xd   :  { %358 = dma.done.wait [#allocation7], 272  }
   0xe   :  { %359 = vsyncadd [#allocation7], 4294967024  ;;  %v237_v0 = vld [vmem:[#allocation3] sm:$0xff]   ;;  %vm75_vm0 = vcmask 261120   ;;  %v367_v5 = vmov 32.0   ;;  %v235_v29 = vld [vmem:[#allocation8 + $0x8] sm:$0xff] }
   0xf   :  { %v238_v1 = vunpack.c.l.bf16 %v237_v0  ;;  %v239_v3 = vunpack.c.h.bf16 %v237_v0  ;;  %250 = vrcp.f32 %v367_v5  ;;  %187 = vmatpush.bf16.msra.mxu0 %v235_v29  ;;  %v234_v31 = vld [vmem:[#allocation8] sm:$0xff]  ;;  %v247_v45 = vld [vmem:[#allocation6] ss:$0 sm:$0xff]  ;;  %v248_v50 = vld [vmem:[%s433_s2] ss:$0 sm:$0xff]  ;;  %vm147_vm6 = vcmask 257024  }
  0x10   :  { %v249_v63 = vld [vmem:[%s435_s4] ss:$0 sm:$0xff]  ;;  %vm197_vm7 = vcmask 781312   ;;  %s368_s10 = smov [#allocation9]   ;;  %s206_s14 = sshll.u32 %s436_s5, 4  ;;  %s207_s14 = int_to_ptr.hbm [resolvable:$true] %s206_s14 }
  0x11   :  { %v76_v2 = vsel %vm75_vm0, %v238_v1, 0.0  ;;  %v79_v4 = vsel %vm75_vm0, %v239_v3, 0.0  ;;  %s204_s11 = sshll.u32 %s368_s10, 4  ;;  %s205_s11 = int_to_ptr.vmem [resolvable:$true] %s204_s11 }
  0x12   :  { %77 = vadd.xlane.f32.xlu0 %v76_v2 }
  0x13   :  { %188 = vmatpush.bf16.msra.mxu0 %v234_v31 }
  0x15   :  { %v251_v6 = vpop.eup %250 }
  0x16   :  { %v83_v7 = vmul.f32 32.0, %v251_v6  ;;  %vm87_vm1 = vweird.f32 %v251_v6 }
  0x18   :  { %v84_v8 = vsub.f32 1.0, %v83_v7 }
  0x1a   :  { %80 = vadd.xlane.f32.xlu0 %v79_v4  ;;  %v85_v9 = vmul.f32 %v251_v6, %v84_v8 }
  0x1c   :  { %v86_v10 = vadd.f32 %v251_v6, %v85_v9 }
  0x1e   :  { %v88_v11 = vsel %vm87_vm1, %v251_v6, %v86_v10 }
  0x85   :  { %v78_v12 = vpop.xlane.xlu0 %77 }
  0x86   :  { %v89_v13 = vmul.f32 %v88_v11, %v78_v12 }
  0x88   :  { %v91_v14 = vsub.f32 %v238_v1, %v89_v13 }
  0x8a   :  { %v93_v15 = vmul.f32 %v91_v14, %v91_v14  ;;  %v135_v49 = vmul.f32 %v247_v45, %v91_v14 }
  0x8c   :  { %v95_v16 = vsel %vm75_vm0, %v93_v15, 0.0 }
  0x8d   :  { %96 = vadd.xlane.f32.xlu1 %v95_v16  ;;  %v81_v17 = vpop.xlane.xlu0 %80 }
  0x8e   :  { %v90_v18 = vmul.f32 %v88_v11, %v81_v17 }
  0x90   :  { %v92_v19 = vsub.f32 %v239_v3, %v90_v18 }
  0x92   :  { %v94_v20 = vmul.f32 %v92_v19, %v92_v19  ;;  %v136_v57 = vmul.f32 %v247_v45, %v92_v19 }
  0x94   :  { %v98_v21 = vsel %vm75_vm0, %v94_v20, 0.0 }
  0x95   :  { %99 = vadd.xlane.f32.xlu1 %v98_v21 }
 0x100   :  { %v97_v22 = vpop.xlane.xlu1 %96 }
 0x101   :  { %v101_v23 = vmul.f32 0.032258064, %v97_v22 }
 0x103   :  { %252 = vrsqrt.f32 %v101_v23  ;;  %vm110_vm2 = vcmp.eq.f32.partialorder %v101_v23, inf  ;;  %v113_v38 = vand.u32 2147483648, %v101_v23  ;;  %vm112_vm3 = vcmp.eq.f32.partialorder %v101_v23, 0.0 }
 0x108   :  { %v100_v24 = vpop.xlane.xlu1 %99 }
 0x109   :  { %v253_v25 = vpop.eup %252  ;;  %v102_v26 = vmul.f32 0.032258064, %v100_v24 }
 0x10a   :  { %v104_v27 = vmul.f32 %v253_v25, %v101_v23 }
 0x10b   :  { %254 = vrsqrt.f32 %v102_v26  ;;  %vm122_vm4 = vcmp.eq.f32.partialorder %v102_v26, inf  ;;  %v125_v47 = vand.u32 2147483648, %v102_v26  ;;  %vm124_vm5 = vcmp.eq.f32.partialorder %v102_v26, 0.0 }
 0x10c   :  { %v105_v28 = vmul.f32 %v253_v25, %v104_v27 }
 0x10e   :  { %v106_v30 = vmul.f32 0.5, %v105_v28 }
 0x110   :  { %v107_v32 = vsub.f32 1.5, %v106_v30 }
 0x111   :  { %v255_v33 = vpop.eup %254 }
 0x112   :  { %v108_v34 = vmul.f32 %v253_v25, %v107_v32  ;;  %v116_v35 = vmul.f32 %v255_v33, %v102_v26 }
 0x114   :  { %v109_v36 = vmul.f32 %v108_v34, %v101_v23  ;;  %v117_v37 = vmul.f32 %v255_v33, %v116_v35 }
 0x116   :  { %v111_v39 = vsel %vm110_vm2, %v101_v23, %v109_v36  ;;  %v118_v40 = vmul.f32 0.5, %v117_v37 }
 0x117   :  { %v114_v41 = vsel %vm112_vm3, %v113_v38, %v111_v39 }
 0x118   :  { %v127_v42 = vadd.f32 1e-06, %v114_v41  ;;  %v119_v43 = vsub.f32 1.5, %v118_v40 }
 0x11a   :  { %256 = vrcp.f32 %v127_v42  ;;  %v120_v44 = vmul.f32 %v255_v33, %v119_v43 }
 0x11c   :  { %v121_v46 = vmul.f32 %v120_v44, %v102_v26 }
 0x11e   :  { %v123_v48 = vsel %vm122_vm4, %v102_v26, %v121_v46 }
 0x11f   :  { %v126_v51 = vsel %vm124_vm5, %v125_v47, %v123_v48 }
 0x120   :  { %v257_v52 = vpop.eup %256  ;;  %v128_v53 = vadd.f32 1e-06, %v126_v51 }
 0x121   :  { %v137_v54 = vmul.f32 %v257_v52, %v135_v49 }
 0x122   :  { %258 = vrcp.f32 %v128_v53 }
 0x123   :  { %v143_v55 = vadd.f32 %v248_v50, %v137_v54 }
 0x125   :  { %v145_v56 = vpack.c.bf16 %v143_v55, %v143_v55 }
 0x127   :  { %148 = vst.msk [vmem:[#allocation2] sm:$0xf] %vm147_vm6, %v145_v56 }
 0x128   :  { %v259_v58 = vpop.eup %258 }
 0x129   :  { %v138_v59 = vmul.f32 %v259_v58, %v136_v57 }
 0x12b   :  { %v144_v60 = vadd.f32 %v248_v50, %v138_v59 }
 0x12d   :  { %v146_v61 = vpack.c.bf16 %v144_v60, %v144_v60 }
 0x12f   :  { %149 = vst.msk [vmem:[#allocation2 + $0x4] sm:$0xf] %vm147_vm6, %v146_v61 }
 0x136   :  { %v233_v62 = vld [vmem:[#allocation2] sm:$0xff] }
 0x137   :  { %232 = vmatmul.msk.bf16.vlgmr.msra.gmra.mxu0 %vm75_vm0, %v233_v62 }
 0x1b4   :  { %v190_v0 = vpop.f32.mrf.mxu0 }
 0x1b5   :  { %v191_v1 = vadd.f32 %v249_v63, %v190_v0 }
 0x1b7   :  { %v195_v2 = vpack.c.bf16 %v191_v1, %v191_v1 }
 0x1b9   :  { %198 = vst.msk [vmem:[#allocation9] sm:$0xf] %vm197_vm7, %v195_v2 }
 0x1bc   :  { %v192_v3 = vpop.f32.mrf.mxu0 }
 0x1bd   :  { %v193_v4 = vadd.f32 %v249_v63, %v192_v3 }
 0x1bf   :  { %v196_v5 = vpack.c.bf16 %v193_v4, %v193_v4 }
 0x1c1   :  { %199 = vst.msk [vmem:[#allocation9 + $0x4] sm:$0xf] %vm197_vm7, %v196_v5 }
 0x1c2   :  { %212 = dma.vmem_to_hbm [thread:$0]  %s205_s11, 128, %s207_s14, [#allocation5], %s364_s28, %s364_s28, %s365_s29  }
 0x1c3   :  { %360 = dma.done.wait [#allocation5], 128  }
 0x1c4   :  { %361 = vsyncadd [#allocation5], 4294967168 }
 0x1c5   :  { %217 = vsyncpa [#allocation4], 1 }
 0x1c6   :  { %218 = vsyncpa [#allocation7], 1 }
 0x1c7   :  { %219 = vsyncpa [#allocation5], 1 }

</bundles_post_ra>
